<compile_context>
chip_gen: v6e
topology: v6e:2x2x1
jax: 0.10.0
libtpu: 0.0.40
codegen_flags: <defaults>
</compile_context>

<pallas_src>
import functools

import jax
import jax.numpy as jnp
from jax import lax
from jax.experimental import pallas as pl
from jax.experimental.pallas import tpu as pltpu


def actor_kernel(state_ref, w1_ref, w2_ref, w3_ref, p_ref, out_ref, *, f1, f2):
    # Packed (1, f1 + f1 + f2 + A) parameter row: [gamma1 | beta1 | b2 | b3].
    a = out_ref.shape[1]
    g1 = p_ref[:, 0:f1]
    be1 = p_ref[:, f1:2 * f1]
    b2 = p_ref[:, 2 * f1:2 * f1 + f2]
    b3 = p_ref[:, 2 * f1 + f2:2 * f1 + f2 + a]

    mm_dtype = w1_ref.dtype            # f32, or bf16 for v6e/v7x-friendly matmuls
    x = state_ref[...].astype(mm_dtype)

    # fc1 (bias omitted: no-op under training-mode BatchNorm, see header).
    h1 = jnp.dot(x, w1_ref[...], preferred_element_type=jnp.float32)   # (B, f1) f32

    # BatchNorm1d, training mode (biased variance, eps=1e-5), affine folded
    # into one per-feature scale/shift -> single FMA over the (B, f1) block.
    mean = jnp.mean(h1, axis=0, keepdims=True)                         # (1, f1)
    c = h1 - mean
    var = jnp.mean(c * c, axis=0, keepdims=True)                       # (1, f1)
    scale = g1 * lax.rsqrt(var + 1e-5)                                 # (1, f1)
    shift = be1 - mean * scale                                         # (1, f1)
    a1 = jnp.maximum(h1 * scale + shift, 0.0)                          # ReLU

    # fc2 + ReLU
    h2 = jnp.dot(a1.astype(mm_dtype), w2_ref[...],
                 preferred_element_type=jnp.float32) + b2
    a2 = jnp.maximum(h2, 0.0)

    # fc3 + tanh  (A=4 lanes -> masked store; negligible at this size)
    h3 = jnp.dot(a2.astype(mm_dtype), w3_ref[...],
                 preferred_element_type=jnp.float32) + b3
    out_ref[...] = jnp.tanh(h3)


def pack_params(params, matmul_dtype=jnp.float32):
    """Pack once, reuse across calls: 3 weight slabs (optionally bf16) plus one
    concatenated (1, F1+F1+F2+A) f32 row for all small per-feature vectors."""
    return {
        "w1": params["w1"].astype(matmul_dtype),
        "w2": params["w2"].astype(matmul_dtype),
        "w3": params["w3"].astype(matmul_dtype),
        "vec": jnp.concatenate(
            [params["g1"], params["be1"], params["b2"], params["b3"]],
            axis=1).astype(jnp.float32),
    }


def actor_forward(state, packed):
    """state: (B, state_size) f32; packed: output of pack_params."""
    B = state.shape[0]
    f1 = packed["w1"].shape[1]
    f2 = packed["w2"].shape[1]
    a = packed["w3"].shape[1]
    vmem = pl.BlockSpec(memory_space=pltpu.MemorySpace.VMEM)
    return pl.pallas_call(
        functools.partial(actor_kernel, f1=f1, f2=f2),
        out_shape=jax.ShapeDtypeStruct((B, a), jnp.float32),
        in_specs=[vmem] * 5,
        out_specs=vmem,
    )(state, packed["w1"], packed["w2"], packed["w3"], packed["vec"])


def init_params(key, state_size, action_size, fc1_units=128, fc2_units=256):
    """Deterministic init mimicking the PyTorch module's shapes / ranges."""
    k1, k2, k3, k4, k5, k6 = jax.random.split(key, 6)
    lim1 = 1.0 / jnp.sqrt(jnp.float32(fc1_units))   # hidden_init: weight.size()[0]
    lim2 = 1.0 / jnp.sqrt(jnp.float32(fc2_units))
    return {
        # weights stored as (in, out)  (transposed w.r.t. PyTorch (out, in))
        "w1": jax.random.uniform(k1, (state_size, fc1_units), jnp.float32, -lim1, lim1),
        "b1": jax.random.uniform(k4, (1, fc1_units), jnp.float32, -lim1, lim1),
        "w2": jax.random.uniform(k2, (fc1_units, fc2_units), jnp.float32, -lim2, lim2),
        "b2": jax.random.uniform(k5, (1, fc2_units), jnp.float32, -lim2, lim2),
        "w3": jax.random.uniform(k3, (fc2_units, action_size), jnp.float32, -3e-3, 3e-3),
        "b3": jax.random.uniform(k6, (1, action_size), jnp.float32, -3e-3, 3e-3),
        # BatchNorm1d affine params (default init: gamma=1, beta=0)
        "g1": jnp.ones((1, fc1_units), jnp.float32),
        "be1": jnp.zeros((1, fc1_units), jnp.float32),
    }


def actor_reference(state, p):
    """Pure-JAX reference, faithful to the PyTorch forward (fc1 bias included)."""
    h1 = state @ p["w1"] + p["b1"]
    mean = h1.mean(0, keepdims=True)
    var = ((h1 - mean) ** 2).mean(0, keepdims=True)
    a1 = jnp.maximum(p["g1"] * (h1 - mean) / jnp.sqrt(var + 1e-5) + p["be1"], 0.0)
    a2 = jnp.maximum(a1 @ p["w2"] + p["b2"], 0.0)
    return jnp.tanh(a2 @ p["w3"] + p["b3"])


if __name__ == "__main__":
    # Reacher-like sizes kept small: state_size=33, action_size=4, batch=8.
    state_size, action_size, batch = 33, 4, 8
    key = jax.random.PRNGKey(0)
    kp, ks = jax.random.split(key)
    params = init_params(kp, state_size, action_size)
    state = jax.random.normal(ks, (batch, state_size), jnp.float32)
    ref = actor_reference(state, params)

    # f32 matmul operands (exact path; right choice on v5e elementwise units).
    out_f32 = jax.block_until_ready(actor_forward(state, pack_params(params, jnp.float32)))
    assert out_f32.shape == (batch, action_size)
    assert jnp.allclose(out_f32, ref, atol=1e-4, rtol=1e-4), "f32 kernel mismatch"

    # bf16 matmul operands (v6e/v7x win: half the weight DMA bytes and fewer
    # MXU passes; BN stats / elementwise math remain f32 so this also runs on v5e).
    out_bf16 = jax.block_until_ready(actor_forward(state, pack_params(params, jnp.bfloat16)))
    assert out_bf16.shape == (batch, action_size)
    assert jnp.allclose(out_bf16, ref, atol=1e-2, rtol=5e-2), "bf16 kernel mismatch"

    print("KERNEL_OK")
</pallas_src>

<mosaic_0001>
module attributes {stable_mosaic.version = 11 : i64} {
  func.func @actor_kernel(%arg0: memref<8x33xf32, #tpu.memory_space<vmem>>, %arg1: memref<33x128xf32, #tpu.memory_space<vmem>>, %arg2: memref<128x256xf32, #tpu.memory_space<vmem>>, %arg3: memref<256x4xf32, #tpu.memory_space<vmem>>, %arg4: memref<1x516xf32, #tpu.memory_space<vmem>>, %arg5: memref<8x4xf32, #tpu.memory_space<vmem>>) attributes {dimension_semantics = [], scalar_prefetch = 0 : i64, scratch_operands = 0 : i64, tpu.core_type = #tpu.core_type<tc>} {
    %c0 = arith.constant 0 : index
    %c0_0 = arith.constant 0 : index
    %0 = vector.load %arg4[%c0, %c0_0] : memref<1x516xf32, #tpu.memory_space<vmem>>, vector<1x128xf32>
    %c0_1 = arith.constant 0 : index
    %c128 = arith.constant 128 : index
    %1 = vector.load %arg4[%c0_1, %c128] : memref<1x516xf32, #tpu.memory_space<vmem>>, vector<1x128xf32>
    %c0_2 = arith.constant 0 : index
    %c256 = arith.constant 256 : index
    %2 = vector.load %arg4[%c0_2, %c256] : memref<1x516xf32, #tpu.memory_space<vmem>>, vector<1x256xf32>
    %c0_3 = arith.constant 0 : index
    %c512 = arith.constant 512 : index
    %3 = vector.load %arg4[%c0_3, %c512] : memref<1x516xf32, #tpu.memory_space<vmem>>, vector<1x4xf32>
    %c0_4 = arith.constant 0 : index
    %c0_5 = arith.constant 0 : index
    %4 = vector.load %arg0[%c0_4, %c0_5] : memref<8x33xf32, #tpu.memory_space<vmem>>, vector<8x33xf32>
    %c0_6 = arith.constant 0 : index
    %c0_7 = arith.constant 0 : index
    %5 = vector.load %arg1[%c0_6, %c0_7] : memref<33x128xf32, #tpu.memory_space<vmem>>, vector<33x128xf32>
    %cst = arith.constant dense<0.000000e+00> : vector<8x128xf32>
    %6 = tpu.matmul %4, %5, %cst {dimension_numbers = #tpu.dot_dimension_numbers<[1], [0], [0], [1], [0, 0, 1, 1], [], []>} : vector<8x33xf32>, vector<33x128xf32>, vector<8x128xf32> -> vector<8x128xf32>
    %cst_8 = arith.constant dense<0.000000e+00> : vector<128xf32>
    %7 = vector.multi_reduction <add>, %6, %cst_8 [0] : vector<8x128xf32> to vector<128xf32>
    %8 = vector.shape_cast %7 : vector<128xf32> to vector<1x128xf32>
    %cst_9 = arith.constant 8.000000e+00 : f32
    %9 = vector.broadcast %cst_9 : f32 to vector<1x128xf32>
    %10 = arith.divf %8, %9 : vector<1x128xf32>
    %11 = vector.broadcast %10 : vector<1x128xf32> to vector<8x128xf32>
    %12 = arith.subf %6, %11 : vector<8x128xf32>
    %13 = arith.mulf %12, %12 : vector<8x128xf32>
    %cst_10 = arith.constant dense<0.000000e+00> : vector<128xf32>
    %14 = vector.multi_reduction <add>, %13, %cst_10 [0] : vector<8x128xf32> to vector<128xf32>
    %15 = vector.shape_cast %14 : vector<128xf32> to vector<1x128xf32>
    %cst_11 = arith.constant 8.000000e+00 : f32
    %16 = vector.broadcast %cst_11 : f32 to vector<1x128xf32>
    %17 = arith.divf %15, %16 : vector<1x128xf32>
    %cst_12 = arith.constant 9.99999974E-6 : f32
    %18 = vector.broadcast %cst_12 : f32 to vector<1x128xf32>
    %19 = arith.addf %17, %18 : vector<1x128xf32>
    %20 = math.rsqrt %19 : vector<1x128xf32>
    %21 = arith.mulf %0, %20 : vector<1x128xf32>
    %22 = arith.mulf %10, %21 : vector<1x128xf32>
    %23 = arith.subf %1, %22 : vector<1x128xf32>
    %24 = vector.broadcast %21 : vector<1x128xf32> to vector<8x128xf32>
    %25 = arith.mulf %6, %24 : vector<8x128xf32>
    %26 = vector.broadcast %23 : vector<1x128xf32> to vector<8x128xf32>
    %27 = arith.addf %25, %26 : vector<8x128xf32>
    %cst_13 = arith.constant 0.000000e+00 : f32
    %28 = vector.broadcast %cst_13 : f32 to vector<8x128xf32>
    %29 = arith.maximumf %27, %28 : vector<8x128xf32>
    %c0_14 = arith.constant 0 : index
    %c0_15 = arith.constant 0 : index
    %30 = vector.load %arg2[%c0_14, %c0_15] : memref<128x256xf32, #tpu.memory_space<vmem>>, vector<128x256xf32>
    %cst_16 = arith.constant dense<0.000000e+00> : vector<8x256xf32>
    %31 = tpu.matmul %29, %30, %cst_16 {dimension_numbers = #tpu.dot_dimension_numbers<[1], [0], [0], [1], [0, 0, 1, 1], [], []>} : vector<8x128xf32>, vector<128x256xf32>, vector<8x256xf32> -> vector<8x256xf32>
    %32 = vector.broadcast %2 : vector<1x256xf32> to vector<8x256xf32>
    %33 = arith.addf %31, %32 : vector<8x256xf32>
    %cst_17 = arith.constant 0.000000e+00 : f32
    %34 = vector.broadcast %cst_17 : f32 to vector<8x256xf32>
    %35 = arith.maximumf %33, %34 : vector<8x256xf32>
    %c0_18 = arith.constant 0 : index
    %c0_19 = arith.constant 0 : index
    %36 = vector.load %arg3[%c0_18, %c0_19] : memref<256x4xf32, #tpu.memory_space<vmem>>, vector<256x4xf32>
    %cst_20 = arith.constant dense<0.000000e+00> : vector<8x4xf32>
    %37 = tpu.matmul %35, %36, %cst_20 {dimension_numbers = #tpu.dot_dimension_numbers<[1], [0], [0], [1], [0, 0, 1, 1], [], []>} : vector<8x256xf32>, vector<256x4xf32>, vector<8x4xf32> -> vector<8x4xf32>
    %38 = vector.broadcast %3 : vector<1x4xf32> to vector<8x4xf32>
    %39 = arith.addf %37, %38 : vector<8x4xf32>
    %40 = math.tanh %39 : vector<8x4xf32>
    %c0_21 = arith.constant 0 : index
    %c0_22 = arith.constant 0 : index
    %41 = vector.load %arg5[%c0_21, %c0_22] : memref<8x4xf32, #tpu.memory_space<vmem>>, vector<8x4xf32>
    tpu.vector_store %arg5[%c0_21, %c0_22], %40 {strides = array<i32>} : memref<8x4xf32, #tpu.memory_space<vmem>>, vector<8x4xf32>,
    return
  }
}

</mosaic_0001>

<bundles_post_ra>
// kernel: tpu_custom_call.1
= control target key start
LH: loop header
LB: loop body
LE: loop exit
PB: predicated region body
PF: predicated region fallthrough
CT: control target
= control target key end

     0   :  { %10 = vsyncpa [#allocation3], 0  ;;  %s479_s18 = smov [#allocation2]   ;;  %s727_s0 = inlined_call_operand.vmem [shape: f32[8,33], index: 0, kind: input, shape index: {}]   ;;  %s728_s1 = inlined_call_operand.hbm [shape: f32[33,128], index: 1, kind: input, shape index: {}]   ;;  %s729_s2 = inlined_call_operand.vmem [shape: f32[128,256], index: 2, kind: input, shape index: {}]   ;;  %s730_s3 = inlined_call_operand.vmem [shape: f32[256,4], index: 3, kind: input, shape index: {}]   ;;  %s731_s4 = inlined_call_operand.vmem [shape: f32[1,516], index: 4, kind: input, shape index: {}]   ;;  %s732_s5 = inlined_call_operand.vmem [shape: f32[8,4], index: 5, kind: output, shape index: {}]  }
   0x1   :  { %s18_s19 = sshll.u32 %s479_s18, 4  ;;  %s19_s19 = int_to_ptr.vmem [resolvable:$true] %s18_s19 }
   0x2   :  { %s465_s20 = scalar_lea.vmem %s19_s19, 640  ;;  %p470_p1 = scmp.lt.s32.totalorder %s19_s19, %s19_s19 }
   0x3   :  { %p466_p0 = scmp.ne.s32.totalorder %s19_s19, %s465_s20  ;;  %p471_p2 = scmp.lt.s32.totalorder %s465_s20, %s465_s20 }
   0x5   :  { %p472_p3 = por %p471_p2, %p470_p1 }
   0x7   :  { %p473_p4 = pnand %p472_p3, %p466_p0 }
   0x9   :  { %476 = shalt.err (!%p473_p4)
}
   0xa   :  { %s480_s21 = smov 128   ;;  %s481_s22 = smov 8  }
   0xb   :  { %24 = dma.hbm_to_vmem [thread:$0]  %s728_s1, 640, %s19_s19, [#allocation3], %s480_s21, %s480_s21, %s481_s22  }
   0xc   :  { %477 = dma.done.wait [#allocation3], 640  }
   0xd   :  { %478 = vsyncadd [#allocation3], 4294966656  ;;  %v482_v0 = vmov 0.0   ;;  %vm483_vm0 = vmmov 0   ;;  %vm48_vm1 = vcmask 1040384   ;;  %v42_v2 = vld [vmem:[#allocation2 + $0x18] sm:$0xff] }
   0xe   :  { %435 = vmatprep.subr.mxu0 %v482_v0  ;;  %445 = vmatprep.mubr.msk.f32.mxu0 %vm483_vm0, %v482_v0  ;;  %v43_v1 = vld [vmem:[#allocation2 + $0x20] sm:$0x1]  ;;  %v41_v3 = vld [vmem:[#allocation2 + $0x10] sm:$0xff]  ;;  %v40_v4 = vld [vmem:[#allocation2 + $0x8] sm:$0xff]  ;;  %vm44_vm2 = vcmask 269312   ;;  %vm384_vm3 = vcmask 31744  }
   0xf   :  { %266 = vmatprep.mubr.f32.mxu1 %v482_v0  ;;  %436 = vmatpush3.msk.msra.mxu0 %vm48_vm1, %v43_v1  ;;  %v39_v5 = vld [vmem:[#allocation2] sm:$0xff]  ;;  %v190_v7 = vld [vmem:[%s729_s2 + $0xf8] sm:$0xff]  ;;  %v189_v8 = vld [vmem:[%s729_s2 + $0xf0] sm:$0xff] }
  0x10   :  { %437 = vmatprep.subr.mxu0 %v482_v0  ;;  %v38_v6 = vld [vmem:[%s727_s0] sm:$0xff]  ;;  %202 = vmatprep.subr.mxu1 %v190_v7  ;;  %v188_v9 = vld [vmem:[%s729_s2 + $0xe8] sm:$0xff]  ;;  %v186_v11 = vld [vmem:[%s729_s2 + $0xd8] sm:$0xff] }
  0x11   :  { %438 = vmatpush3.msra.mxu0 %v42_v2  ;;  %203 = vmatpush1.msra.mxu1 %v189_v8  ;;  %v187_v10 = vld [vmem:[%s729_s2 + $0xe0] sm:$0xff]  ;;  %v185_v12 = vld [vmem:[%s729_s2 + $0xd0] sm:$0xff]  ;;  %v184_v13 = vld [vmem:[%s729_s2 + $0xc8] sm:$0xff] }
  0x12   :  { %439 = vmatprep.subr.mxu0 %v482_v0  ;;  %204 = vmatprep.subr.mxu1 %v188_v9  ;;  %v183_v14 = vld [vmem:[%s729_s2 + $0xc0] sm:$0xff]  ;;  %v182_v15 = vld [vmem:[%s729_s2 + $0xb8] sm:$0xff]  ;;  %v181_v16 = vld [vmem:[%s729_s2 + $0xb0] sm:$0xff] }
  0x13   :  { %440 = vmatpush3.msra.mxu0 %v41_v3  ;;  %205 = vmatpush1.msra.mxu1 %v187_v10  ;;  %v180_v17 = vld [vmem:[%s729_s2 + $0xa8] sm:$0xff]  ;;  %v179_v18 = vld [vmem:[%s729_s2 + $0xa0] sm:$0xff]  ;;  %v178_v19 = vld [vmem:[%s729_s2 + $0x98] sm:$0xff] }
  0x14   :  { %441 = vmatprep.subr.mxu0 %v482_v0  ;;  %206 = vmatprep.subr.mxu1 %v186_v11  ;;  %v177_v20 = vld [vmem:[%s729_s2 + $0x90] sm:$0xff]  ;;  %v176_v21 = vld [vmem:[%s729_s2 + $0x88] sm:$0xff]  ;;  %v175_v22 = vld [vmem:[%s729_s2 + $0x80] sm:$0xff] }
  0x15   :  { %442 = vmatpush3.msra.mxu0 %v40_v4  ;;  %207 = vmatpush1.msra.mxu1 %v185_v12  ;;  %v174_v23 = vld [vmem:[%s729_s2 + $0x78] sm:$0xff]  ;;  %v173_v24 = vld [vmem:[%s729_s2 + $0x70] sm:$0xff]  ;;  %v172_v25 = vld [vmem:[%s729_s2 + $0x68] sm:$0xff] }
  0x16   :  { %443 = vmatprep.subr.mxu0 %v482_v0  ;;  %208 = vmatprep.subr.mxu1 %v184_v13  ;;  %v171_v26 = vld [vmem:[%s729_s2 + $0x60] sm:$0xff]  ;;  %v170_v27 = vld [vmem:[%s729_s2 + $0x58] sm:$0xff]  ;;  %v169_v28 = vld [vmem:[%s729_s2 + $0x50] sm:$0xff] }
  0x17   :  { %444 = vmatpush3.msra.mxu0 %v39_v5  ;;  %209 = vmatpush1.msra.mxu1 %v183_v14  ;;  %v168_v29 = vld [vmem:[%s729_s2 + $0x48] sm:$0xff]  ;;  %v167_v30 = vld [vmem:[%s729_s2 + $0x40] sm:$0xff]  ;;  %v166_v31 = vld [vmem:[%s729_s2 + $0x38] sm:$0xff] }
  0x18   :  { %446 = vmatmul.mubr.msk.f32.vlgmr.msra.gmra.mxu0 %vm44_vm2, %v38_v6  ;;  %210 = vmatprep.subr.mxu1 %v182_v15  ;;  %v165_v32 = vld [vmem:[%s729_s2 + $0x30] sm:$0xff]  ;;  %v164_v33 = vld [vmem:[%s729_s2 + $0x28] sm:$0xff]  ;;  %v163_v34 = vld [vmem:[%s729_s2 + $0x20] sm:$0xff] }
  0x19   :  { %211 = vmatpush1.msra.mxu1 %v181_v16  ;;  %v162_v35 = vld [vmem:[%s729_s2 + $0x18] sm:$0xff]  ;;  %v161_v36 = vld [vmem:[%s729_s2 + $0x10] sm:$0xff]  ;;  %v160_v37 = vld [vmem:[%s729_s2 + $0x8] sm:$0xff] }
  0x1a   :  { %212 = vmatprep.subr.mxu1 %v180_v17  ;;  %v159_v38 = vld [vmem:[%s729_s2] sm:$0xff]  ;;  %v306_v39 = vld [vmem:[%s730_s3 + $0xf8] sm:$0xff]  ;;  %v305_v41 = vld [vmem:[%s730_s3 + $0xf0] sm:$0xff] }
  0x1b   :  { %213 = vmatpush1.msra.mxu1 %v179_v18  ;;  %v290_v40 = vld [vmem:[%s730_s3 + $0x78] sm:$0xff]  ;;  %400 = vmatprep.subr.mxu0 %v306_v39  ;;  %v289_v42 = vld [vmem:[%s730_s3 + $0x70] sm:$0xff]  ;;  %v304_v43 = vld [vmem:[%s730_s3 + $0xe8] sm:$0xff]  ;;  %v145_v18 = vlaneseq }
  0x1c   :  { %214 = vmatprep.subr.mxu1 %v178_v19  ;;  %401 = vmatpush3.msra.mxu0 %v290_v40  ;;  %v288_v44 = vld [vmem:[%s730_s3 + $0x68] sm:$0xff]  ;;  %v303_v45 = vld [vmem:[%s730_s3 + $0xe0] sm:$0xff]  ;;  %v302_v47 = vld [vmem:[%s730_s3 + $0xd8] sm:$0xff] }
  0x1d   :  { %215 = vmatpush1.msra.mxu1 %v177_v20  ;;  %402 = vmatprep.subr.mxu0 %v305_v41  ;;  %v287_v46 = vld [vmem:[%s730_s3 + $0x60] sm:$0xff]  ;;  %v286_v48 = vld [vmem:[%s730_s3 + $0x58] sm:$0xff]  ;;  %v301_v49 = vld [vmem:[%s730_s3 + $0xd0] sm:$0xff]  ;;  %v146_v19 = vshrl.u32 %v145_v18, 7 }
  0x1e   :  { %216 = vmatprep.subr.mxu1 %v176_v21  ;;  %403 = vmatpush3.msra.mxu0 %v289_v42  ;;  %v285_v50 = vld [vmem:[%s730_s3 + $0x50] sm:$0xff]  ;;  %v300_v51 = vld [vmem:[%s730_s3 + $0xc8] sm:$0xff]  ;;  %v299_v53 = vld [vmem:[%s730_s3 + $0xc0] sm:$0xff] }
  0x1f   :  { %217 = vmatpush1.msra.mxu1 %v175_v22  ;;  %404 = vmatprep.subr.mxu0 %v304_v43  ;;  %v284_v52 = vld [vmem:[%s730_s3 + $0x48] sm:$0xff]  ;;  %v283_v54 = vld [vmem:[%s730_s3 + $0x40] sm:$0xff]  ;;  %v298_v55 = vld [vmem:[%s730_s3 + $0xb8] sm:$0xff]  ;;  %v147_v21 = vsub.s32 0, %v146_v19  ;;  %v198_v41 = vsub.s32 1, %v146_v19 }
  0x20   :  { %218 = vmatprep.subr.mxu1 %v174_v23  ;;  %405 = vmatpush3.msra.mxu0 %v288_v44  ;;  %v282_v56 = vld [vmem:[%s730_s3 + $0x38] sm:$0xff]  ;;  %v297_v57 = vld [vmem:[%s730_s3 + $0xb0] sm:$0xff]  ;;  %v296_v59 = vld [vmem:[%s730_s3 + $0xa8] sm:$0xff] }
  0x21   :  { %219 = vmatpush1.msra.mxu1 %v173_v24  ;;  %406 = vmatprep.subr.mxu0 %v303_v45  ;;  %v281_v58 = vld [vmem:[%s730_s3 + $0x30] sm:$0xff]  ;;  %v280_v60 = vld [vmem:[%s730_s3 + $0x28] sm:$0xff]  ;;  %v295_v61 = vld [vmem:[%s730_s3 + $0xa0] sm:$0xff] }
  0x22   :  { %220 = vmatprep.subr.mxu1 %v172_v25  ;;  %407 = vmatpush3.msra.mxu0 %v287_v46  ;;  %v279_v62 = vld [vmem:[%s730_s3 + $0x20] sm:$0xff] }
  0x23   :  { %221 = vmatpush1.msra.mxu1 %v171_v26  ;;  %408 = vmatprep.subr.mxu0 %v302_v47  ;;  %v34_v20 = vld [vmem:[%s731_s4] sm:$0x1]  ;;  %v35_v24 = vld [vmem:[%s731_s4 + $0x1] sm:$0x1]  ;;  %v36_v40 = vld [vmem:[%s731_s4 + $0x2] sm:$0x3] }
  0x24   :  { %222 = vmatprep.subr.mxu1 %v170_v27  ;;  %409 = vmatpush3.msra.mxu0 %v286_v48  ;;  %v275_v39 = vld [vmem:[%s730_s3] sm:$0xff]  ;;  %v195_v42 = vrot.slane %v36_v40, %v147_v21  ;;  %v199_v43 = vrot.slane %v36_v40, %v198_v41 }
  0x25   :  { %223 = vmatpush1.msra.mxu1 %v169_v28  ;;  %410 = vmatprep.subr.mxu0 %v301_v49 }
  0x26   :  { %224 = vmatprep.subr.mxu1 %v168_v29  ;;  %411 = vmatpush3.msra.mxu0 %v285_v50 }
  0x27   :  { %225 = vmatpush1.msra.mxu1 %v167_v30  ;;  %412 = vmatprep.subr.mxu0 %v300_v51  ;;  %v393_v51 = vld [vmem:[%s731_s4 + $0x4] ss:$0 sm:$0xff] }
  0x28   :  { %226 = vmatprep.subr.mxu1 %v166_v31  ;;  %413 = vmatpush3.msra.mxu0 %v284_v52 }
  0x29   :  { %227 = vmatpush1.msra.mxu1 %v165_v32  ;;  %414 = vmatprep.subr.mxu0 %v299_v53  ;;  %v294_v32 = vld [vmem:[%s730_s3 + $0x98] sm:$0xff] }
  0x2a   :  { %228 = vmatprep.subr.mxu1 %v164_v33  ;;  %415 = vmatpush3.msra.mxu0 %v283_v54  ;;  %v278_v33 = vld [vmem:[%s730_s3 + $0x18] sm:$0xff] }
  0x2b   :  { %229 = vmatpush1.msra.mxu1 %v163_v34  ;;  %416 = vmatprep.subr.mxu0 %v298_v55  ;;  %v293_v34 = vld [vmem:[%s730_s3 + $0x90] sm:$0xff] }
  0x2c   :  { %230 = vmatprep.subr.mxu1 %v162_v35  ;;  %417 = vmatpush3.msra.mxu0 %v282_v56  ;;  %v277_v35 = vld [vmem:[%s730_s3 + $0x10] sm:$0xff] }
  0x2d   :  { %231 = vmatpush1.msra.mxu1 %v161_v36  ;;  %418 = vmatprep.subr.mxu0 %v297_v57  ;;  %v292_v36 = vld [vmem:[%s730_s3 + $0x88] sm:$0xff] }
  0x2e   :  { %232 = vmatprep.subr.mxu1 %v160_v37  ;;  %419 = vmatpush3.msra.mxu0 %v281_v58  ;;  %v276_v37 = vld [vmem:[%s730_s3 + $0x8] sm:$0xff] }
  0x2f   :  { %233 = vmatpush1.msra.mxu1 %v159_v38  ;;  %420 = vmatprep.subr.mxu0 %v296_v59  ;;  %v291_v38 = vld [vmem:[%s730_s3 + $0x80] sm:$0xff] }
  0x30   :  { %421 = vmatpush3.msra.mxu0 %v280_v60 }
  0x31   :  { %422 = vmatprep.subr.mxu0 %v295_v61 }
  0x32   :  { %423 = vmatpush3.msra.mxu0 %v279_v62 }
  0x33   :  { %424 = vmatprep.subr.mxu0 %v294_v32 }
  0x34   :  { %425 = vmatpush3.msra.mxu0 %v278_v33 }
  0x35   :  { %426 = vmatprep.subr.mxu0 %v293_v34 }
  0x36   :  { %427 = vmatpush3.msra.mxu0 %v277_v35 }
  0x37   :  { %428 = vmatprep.subr.mxu0 %v292_v36 }
  0x38   :  { %429 = vmatpush3.msra.mxu0 %v276_v37 }
  0x39   :  { %430 = vmatprep.subr.mxu0 %v291_v38 }
  0x3a   :  { %431 = vmatpush3.msra.mxu0 %v275_v39 }
  0xd8   :  { %v118_v63 = vpop.f32.mrf.mxu0 }
  0xd9   :  { %v122_v0 = vrot.slane %v118_v63, 4 }
  0xda   :  { %v447_v1 = vpop.f32.mrf.mxu0 }
  0xdb   :  { %v123_v2 = vadd.f32 %v122_v0, %v118_v63 }
  0xdd   :  { %v124_v3 = vrot.slane %v123_v2, 2 }
  0xdf   :  { %v125_v4 = vadd.f32 %v124_v3, %v123_v2 }
  0xe1   :  { %v126_v5 = vrot.slane %v125_v4, 1 }
  0xe3   :  { %v127_v6 = vadd.f32 %v126_v5, %v125_v4 }
  0xe5   :  { %v129_v7 = vmul.f32 0.125, %v127_v6 }
  0xe7   :  { %v130_v8 = vsub.f32 %v118_v63, %v129_v7 }
  0xe9   :  { %v131_v9 = vmul.f32 %v130_v8, %v130_v8 }
  0xeb   :  { %v132_v10 = vrot.slane %v131_v9, 4 }
  0xed   :  { %v133_v11 = vadd.f32 %v132_v10, %v131_v9 }
  0xef   :  { %v134_v12 = vrot.slane %v133_v11, 2 }
  0xf1   :  { %v135_v13 = vadd.f32 %v134_v12, %v133_v11 }
  0xf3   :  { %v136_v14 = vrot.slane %v135_v13, 1 }
  0xf5   :  { %v137_v15 = vadd.f32 %v136_v14, %v135_v13 }
  0xf7   :  { %v138_v16 = vmul.f32 0.125, %v137_v15 }
  0xf9   :  { %v139_v17 = vadd.f32 1e-05, %v138_v16 }
  0xfb   :  { %453 = vrsqrt.f32 %v139_v17 }
 0x108   :  { %v454_v22 = vpop.eup %453 }
 0x109   :  { %v141_v23 = vmul.f32 %v454_v22, %v34_v20 }
 0x10b   :  { %v142_v25 = vmul.f32 %v141_v23, %v129_v7  ;;  %v148_v26 = vrot.slane %v141_v23, %v147_v21 }
 0x10d   :  { %v143_v27 = vsub.f32 %v35_v24, %v142_v25  ;;  %v150_v28 = vmul.f32 %v148_v26, %v118_v63 }
 0x10f   :  { %v155_v29 = vrot.slane %v143_v27, %v147_v21 }
 0x111   :  { %v157_v30 = vadd.f32 %v155_v29, %v150_v28 }
 0x113   :  { %v158_v31 = vmax.f32 %v157_v30, 0.0 }
 0x115   :  { %267 = vmatmul.mubr.f32.vlgmr.msra.gmra.mxu1 %v158_v31 }
 0x1d5   :  { %v268_v44 = vpop.f32.mrf.mxu1 }
 0x1d6   :  { %v269_v45 = vadd.f32 %v268_v44, %v195_v42 }
 0x1d7   :  { %v270_v46 = vpop.f32.mrf.mxu1 }
 0x1d8   :  { %v271_v47 = vadd.f32 %v270_v46, %v199_v43  ;;  %v273_v49 = vmax.f32 %v269_v45, 0.0 }
 0x1da   :  { %v274_v48 = vmax.f32 %v271_v47, 0.0 }
 0x1dc   :  { %377 = vmatprep.mubr.f32.mxu0 %v274_v48 }
 0x1dd   :  { %378 = vmatmul.mubr.f32.vlgmr.msra.gmra.mxu0 %v273_v49 }
 0x29d   :  { %v432_v50 = vpop.f32.mrf.mxu0 }
 0x29f   :  { %v433_v52 = vpop.f32.mrf.mxu0 }
 0x2a0   :  { %v434_v53 = vadd.f32 %v433_v52, %v432_v50 }
 0x2a2   :  { %v380_v54 = vadd.f32 %v434_v53, %v393_v51 }
 0x2a4   :  { %455 = vtanh.f32 %v380_v54 }
 0x2b1   :  { %v456_v55 = vpop.eup %455 }
 0x2b2   :  { %385 = vst.msk [vmem:[%s732_s5] sm:$0xff] %vm384_vm3, %v456_v55 }
 0x2b3   :  { %390 = vsyncpa [#allocation3], 1 }

</bundles_post_ra>
